<compile_context>
chip_gen: v7x
topology: tpu7x:2x2x1
jax: 0.10.0
libtpu: 0.0.40
codegen_flags: <defaults>
</compile_context>

<pallas_src>
import numpy as np
import jax
import jax.numpy as jnp
from jax.experimental import pallas as pl
from jax.experimental.pallas import tpu as pltpu


# ----------------------------- Pallas kernel -------------------------------


def _point_encoder_kernel(pc_ref, w1_ref, b1_ref, w2_ref, b2_ref,
                          w3_ref, b3_ref, out_ref, maxacc_ref):
    """Point encoder over one (Bt, Nt, C) tile with a running-max accumulator."""
    k = pl.program_id(1)

    # Initialize the per-batch running max on the first N-tile.
    @pl.when(k == 0)
    def _init():
        maxacc_ref[...] = jnp.full(maxacc_ref.shape, -jnp.inf, maxacc_ref.dtype)

    bt, nt, c = pc_ref.shape
    # Fold batch x points into one big matmul M dimension.  nt % 8 == 0, so
    # this collapse is sublane-tile aligned and does not relayout VMEM.
    feat = pc_ref[...].reshape(bt * nt, c)                        # (Bt*Nt, C)

    # Per-point MLP (MXU matmuls, f32 accumulation; gelu runs on the EUP).
    h1 = jnp.dot(feat, w1_ref[...], preferred_element_type=jnp.float32)
    h1 = jax.nn.gelu(h1 + b1_ref[...])                            # (Bt*Nt, H)
    h2 = jnp.dot(h1, w2_ref[...], preferred_element_type=jnp.float32)
    h2 = h2 + b2_ref[...]                                         # (Bt*Nt, H)

    # Symmetric (permutation-invariant) max pool over this tile's points,
    # folded into the running accumulator.
    tile_max = jnp.max(h2.reshape(bt, nt, -1), axis=1)            # (Bt, H)
    maxacc_ref[...] = jnp.maximum(maxacc_ref[...], tile_max)

    # Final projection once all N-tiles have been reduced.
    @pl.when(k == pl.num_programs(1) - 1)
    def _finalize():
        pooled = maxacc_ref[...]                                  # (Bt, H)
        out = jnp.dot(pooled, w3_ref[...], preferred_element_type=jnp.float32)
        out_ref[...] = (out + b3_ref[...]).astype(out_ref.dtype)  # (Bt, E)


def point_encoder_pallas(pc6, params, *, block_b=None, block_n=None):
    """pc6: (B, N, C) points (xyz ++ color).  Returns (B, E) embeddings."""
    B, N, C = pc6.shape
    assert C == params["w1"].shape[0], "input channels must match w1"
    H = params["w1"].shape[1]
    E = params["w3"].shape[1]

    # Tile sizes: cap the point tile so (Bt*Nt, H) intermediates stay well
    # inside v7x's 64 MiB VMEM even at H~1024; block the batch so Bt*Nt feeds
    # the MXU a large M dimension.
    if block_n is None:
        block_n = N if N <= 2048 else 2048
    if block_b is None:
        block_b = B
    assert N % block_n == 0 and block_n % 8 == 0, (
        "block_n must divide N and be a multiple of 8 (no pad-masking path)")
    assert B % block_b == 0, "block_b must divide B"
    assert block_b == B or block_b % 8 == 0, (
        "output block (Bt, E) must be full-B or 8-aligned on the sublane axis")

    grid = (B // block_b, N // block_n)

    weight_bytes = sum(int(np.prod(params[n].shape)) for n in
                       ("w1", "b1", "w2", "b2", "w3", "b3")) * 4
    cost = pl.CostEstimate(
        flops=2 * B * N * (C * H + H * H) + 2 * B * H * E,
        transcendentals=B * N * H,                     # gelu
        bytes_accessed=(B * N * C + B * E) * 4 + weight_bytes,
    )

    out = pl.pallas_call(
        _point_encoder_kernel,
        out_shape=jax.ShapeDtypeStruct((B, E), jnp.float32),
        grid_spec=pltpu.PrefetchScalarGridSpec(
            num_scalar_prefetch=0,
            grid=grid,
            in_specs=[
                pl.BlockSpec((block_b, block_n, C), lambda b, k: (b, k, 0)),  # pc
                pl.BlockSpec((C, H), lambda b, k: (0, 0)),                    # w1
                pl.BlockSpec((1, H), lambda b, k: (0, 0)),                    # b1
                pl.BlockSpec((H, H), lambda b, k: (0, 0)),                    # w2
                pl.BlockSpec((1, H), lambda b, k: (0, 0)),                    # b2
                pl.BlockSpec((H, E), lambda b, k: (0, 0)),                    # w3
                pl.BlockSpec((1, E), lambda b, k: (0, 0)),                    # b3
            ],
            out_specs=pl.BlockSpec((block_b, E), lambda b, k: (b, 0)),
            scratch_shapes=[pltpu.VMEM((block_b, H), jnp.float32)],
        ),
        compiler_params=pltpu.CompilerParams(
            dimension_semantics=("parallel", "arbitrary"),
            vmem_limit_bytes=48 * 1024 * 1024,
        ),
        cost_estimate=cost,
    )(pc6, params["w1"], params["b1"], params["w2"], params["b2"],
      params["w3"], params["b3"])
    return out                                                     # (B, E)


# ------------------------------- Uni3D glue --------------------------------


def init_uni3d_params(key, hidden=32, embed=32):
    k1, k2, k3 = jax.random.split(key, 3)
    scale1 = 1.0 / np.sqrt(6.0)
    scale2 = 1.0 / np.sqrt(hidden)
    return {
        "logit_scale": jnp.asarray(np.log(1.0 / 0.07), jnp.float32),  # unused in fwd
        "w1": jax.random.normal(k1, (6, hidden), jnp.float32) * scale1,
        "b1": jnp.zeros((1, hidden), jnp.float32),
        "w2": jax.random.normal(k2, (hidden, hidden), jnp.float32) * scale2,
        "b2": jnp.zeros((1, hidden), jnp.float32),
        "w3": jax.random.normal(k3, (hidden, embed), jnp.float32) * scale2,
        "b3": jnp.zeros((1, embed), jnp.float32),
    }


def uni3d_forward(pc, params, return_penultimate=True, *, block_b=None, block_n=None):
    """Mirrors Uni3D.forward.

    Uni3D splits pc into xyz = pc[..., :3] and color = pc[..., 3:] (or zeros)
    and hands both to the point encoder, which immediately re-concatenates
    them channel-wise.  The split+concat round-trip is fused in the wrapper so
    the kernel receives one 6-channel array (identical math).
    """
    if not return_penultimate:
        raise NotImplementedError
    xyz = pc[:, :, :3]
    if pc.shape[-1] == 6:
        color = pc[:, :, 3:]
    else:
        color = jnp.zeros(pc.shape, pc.dtype)   # matches torch.zeros(pc.size())
    pc6 = jnp.concatenate([xyz, color], axis=-1)
    return point_encoder_pallas(pc6, params, block_b=block_b, block_n=block_n)


# Pure-JAX reference (same math, no Pallas) for a correctness check.
def _reference_forward(pc, params):
    xyz = pc[:, :, :3]
    color = pc[:, :, 3:] if pc.shape[-1] == 6 else jnp.zeros(pc.shape, pc.dtype)
    feat = jnp.concatenate([xyz, color], axis=-1)
    h1 = jax.nn.gelu(feat @ params["w1"] + params["b1"])
    h2 = h1 @ params["w2"] + params["b2"]
    pooled = jnp.max(h2, axis=1)
    return pooled @ params["w3"] + params["b3"]


if __name__ == "__main__":
    key = jax.random.PRNGKey(0)
    k_pc, k_param = jax.random.split(key)

    B, N = 2, 16
    pc = jax.random.normal(k_pc, (B, N, 6), jnp.float32)   # (batch, points, xyz+rgb)
    params = init_uni3d_params(k_param, hidden=32, embed=32)

    # block_n=8 exercises the multi-step running-max reduction (2 N-tiles).
    out = uni3d_forward(pc, params, return_penultimate=True, block_b=B, block_n=8)
    out = jax.block_until_ready(out)

    ref = _reference_forward(pc, params)
    np.testing.assert_allclose(np.asarray(out), np.asarray(ref),
                               rtol=1e-5, atol=1e-5)
    print("KERNEL_OK")
</pallas_src>

<mosaic_0001>
module attributes {stable_mosaic.version = 11 : i64} {
  func.func @_point_encoder_kernel(%arg0: i32, %arg1: i32, %arg2: memref<2x8x6xf32, #tpu.memory_space<vmem>>, %arg3: memref<6x32xf32, #tpu.memory_space<vmem>>, %arg4: memref<1x32xf32, #tpu.memory_space<vmem>>, %arg5: memref<32x32xf32, #tpu.memory_space<vmem>>, %arg6: memref<1x32xf32, #tpu.memory_space<vmem>>, %arg7: memref<32x32xf32, #tpu.memory_space<vmem>>, %arg8: memref<1x32xf32, #tpu.memory_space<vmem>>, %arg9: memref<2x32xf32, #tpu.memory_space<vmem>>, %arg10: memref<2x32xf32, #tpu.memory_space<vmem>>) attributes {dimension_semantics = [#tpu.dimension_semantics<parallel>, #tpu.dimension_semantics<arbitrary>], iteration_bounds = array<i64: 1, 2>, scalar_prefetch = 0 : i64, scratch_operands = 1 : i64, tpu.core_type = #tpu.core_type<tc>, window_params = [{transform_indices = @transform_0, window_bounds = array<i64: 2, 8, 6>}, {pipeline_mode = #tpu.pipeline_mode<synchronous>, transform_indices = @transform_1, window_bounds = array<i64: 6, 32>}, {pipeline_mode = #tpu.pipeline_mode<synchronous>, transform_indices = @transform_2, window_bounds = array<i64: 1, 32>}, {pipeline_mode = #tpu.pipeline_mode<synchronous>, transform_indices = @transform_3, window_bounds = array<i64: 32, 32>}, {pipeline_mode = #tpu.pipeline_mode<synchronous>, transform_indices = @transform_4, window_bounds = array<i64: 1, 32>}, {pipeline_mode = #tpu.pipeline_mode<synchronous>, transform_indices = @transform_5, window_bounds = array<i64: 32, 32>}, {pipeline_mode = #tpu.pipeline_mode<synchronous>, transform_indices = @transform_6, window_bounds = array<i64: 1, 32>}, {transform_indices = @transform_7, window_bounds = array<i64: 2, 32>}]} {
    %c0_i32 = arith.constant 0 : i32
    %0 = arith.cmpi eq, %arg1, %c0_i32 : i32
    %1 = arith.extui %0 : i1 to i32
    %c0_i32_0 = arith.constant 0 : i32
    %2 = arith.cmpi ne, %1, %c0_i32_0 : i32
    scf.if %2 {
      %cst_22 = arith.constant 0xFF800000 : f32
      %36 = vector.broadcast %cst_22 : f32 to vector<2x32xf32>
      %c0_23 = arith.constant 0 : index
      %c0_24 = arith.constant 0 : index
      %37 = vector.load %arg10[%c0_23, %c0_24] : memref<2x32xf32, #tpu.memory_space<vmem>>, vector<2x32xf32>
      tpu.vector_store %arg10[%c0_23, %c0_24], %36 {strides = array<i32>} : memref<2x32xf32, #tpu.memory_space<vmem>>, vector<2x32xf32>,
    } else {
    }
    %c0 = arith.constant 0 : index
    %c0_1 = arith.constant 0 : index
    %c0_2 = arith.constant 0 : index
    %3 = vector.load %arg2[%c0, %c0_1, %c0_2] : memref<2x8x6xf32, #tpu.memory_space<vmem>>, vector<2x8x6xf32>
    %4 = vector.shape_cast %3 : vector<2x8x6xf32> to vector<16x6xf32>
    %c0_3 = arith.constant 0 : index
    %c0_4 = arith.constant 0 : index
    %5 = vector.load %arg3[%c0_3, %c0_4] : memref<6x32xf32, #tpu.memory_space<vmem>>, vector<6x32xf32>
    %cst = arith.constant dense<0.000000e+00> : vector<16x32xf32>
    %6 = tpu.matmul %4, %5, %cst {dimension_numbers = #tpu.dot_dimension_numbers<[1], [0], [0], [1], [0, 0, 1, 1], [], []>} : vector<16x6xf32>, vector<6x32xf32>, vector<16x32xf32> -> vector<16x32xf32>
    %c0_5 = arith.constant 0 : index
    %c0_6 = arith.constant 0 : index
    %7 = vector.load %arg4[%c0_5, %c0_6] : memref<1x32xf32, #tpu.memory_space<vmem>>, vector<1x32xf32>
    %8 = vector.broadcast %7 : vector<1x32xf32> to vector<16x32xf32>
    %9 = arith.addf %6, %8 : vector<16x32xf32>
    %10 = arith.mulf %9, %9 : vector<16x32xf32>
    %11 = arith.mulf %9, %10 : vector<16x32xf32>
    %cst_7 = arith.constant 4.471500e-02 : f32
    %12 = vector.broadcast %cst_7 : f32 to vector<16x32xf32>
    %13 = arith.mulf %12, %11 : vector<16x32xf32>
    %14 = arith.addf %9, %13 : vector<16x32xf32>
    %cst_8 = arith.constant 0.797884583 : f32
    %15 = vector.broadcast %cst_8 : f32 to vector<16x32xf32>
    %16 = arith.mulf %15, %14 : vector<16x32xf32>
    %17 = math.tanh %16 : vector<16x32xf32>
    %cst_9 = arith.constant 1.000000e+00 : f32
    %18 = vector.broadcast %cst_9 : f32 to vector<16x32xf32>
    %19 = arith.addf %18, %17 : vector<16x32xf32>
    %cst_10 = arith.constant 5.000000e-01 : f32
    %20 = vector.broadcast %cst_10 : f32 to vector<16x32xf32>
    %21 = arith.mulf %20, %19 : vector<16x32xf32>
    %22 = arith.mulf %9, %21 : vector<16x32xf32>
    %c0_11 = arith.constant 0 : index
    %c0_12 = arith.constant 0 : index
    %23 = vector.load %arg5[%c0_11, %c0_12] : memref<32x32xf32, #tpu.memory_space<vmem>>, vector<32x32xf32>
    %cst_13 = arith.constant dense<0.000000e+00> : vector<16x32xf32>
    %24 = tpu.matmul %22, %23, %cst_13 {dimension_numbers = #tpu.dot_dimension_numbers<[1], [0], [0], [1], [0, 0, 1, 1], [], []>} : vector<16x32xf32>, vector<32x32xf32>, vector<16x32xf32> -> vector<16x32xf32>
    %c0_14 = arith.constant 0 : index
    %c0_15 = arith.constant 0 : index
    %25 = vector.load %arg6[%c0_14, %c0_15] : memref<1x32xf32, #tpu.memory_space<vmem>>, vector<1x32xf32>
    %26 = vector.broadcast %25 : vector<1x32xf32> to vector<16x32xf32>
    %27 = arith.addf %24, %26 : vector<16x32xf32>
    %28 = vector.shape_cast %27 : vector<16x32xf32> to vector<2x8x32xf32>
    %cst_16 = arith.constant dense<0xFF800000> : vector<2x32xf32>
    %29 = vector.multi_reduction <maximumf>, %28, %cst_16 [1] : vector<2x8x32xf32> to vector<2x32xf32>
    %c0_17 = arith.constant 0 : index
    %c0_18 = arith.constant 0 : index
    %30 = vector.load %arg10[%c0_17, %c0_18] : memref<2x32xf32, #tpu.memory_space<vmem>>, vector<2x32xf32>
    %31 = arith.maximumf %30, %29 : vector<2x32xf32>
    %c0_19 = arith.constant 0 : index
    %c0_20 = arith.constant 0 : index
    %32 = vector.load %arg10[%c0_19, %c0_20] : memref<2x32xf32, #tpu.memory_space<vmem>>, vector<2x32xf32>
    tpu.vector_store %arg10[%c0_19, %c0_20], %31 {strides = array<i32>} : memref<2x32xf32, #tpu.memory_space<vmem>>, vector<2x32xf32>,
    %c1_i32 = arith.constant 1 : i32
    %33 = arith.cmpi eq, %arg1, %c1_i32 : i32
    %34 = arith.extui %33 : i1 to i32
    %c0_i32_21 = arith.constant 0 : i32
    %35 = arith.cmpi ne, %34, %c0_i32_21 : i32
    scf.if %35 {
      %c0_22 = arith.constant 0 : index
      %c0_23 = arith.constant 0 : index
      %36 = vector.load %arg10[%c0_22, %c0_23] : memref<2x32xf32, #tpu.memory_space<vmem>>, vector<2x32xf32>
      %c0_24 = arith.constant 0 : index
      %c0_25 = arith.constant 0 : index
      %37 = vector.load %arg7[%c0_24, %c0_25] : memref<32x32xf32, #tpu.memory_space<vmem>>, vector<32x32xf32>
      %cst_26 = arith.constant dense<0.000000e+00> : vector<2x32xf32>
      %38 = tpu.matmul %36, %37, %cst_26 {dimension_numbers = #tpu.dot_dimension_numbers<[1], [0], [0], [1], [0, 0, 1, 1], [], []>} : vector<2x32xf32>, vector<32x32xf32>, vector<2x32xf32> -> vector<2x32xf32>
      %c0_27 = arith.constant 0 : index
      %c0_28 = arith.constant 0 : index
      %39 = vector.load %arg8[%c0_27, %c0_28] : memref<1x32xf32, #tpu.memory_space<vmem>>, vector<1x32xf32>
      %40 = vector.broadcast %39 : vector<1x32xf32> to vector<2x32xf32>
      %41 = arith.addf %38, %40 : vector<2x32xf32>
      %c0_29 = arith.constant 0 : index
      %c0_30 = arith.constant 0 : index
      %42 = vector.load %arg9[%c0_29, %c0_30] : memref<2x32xf32, #tpu.memory_space<vmem>>, vector<2x32xf32>
      tpu.vector_store %arg9[%c0_29, %c0_30], %41 {strides = array<i32>} : memref<2x32xf32, #tpu.memory_space<vmem>>, vector<2x32xf32>,
    } else {
    }
    return
  }
  func.func @transform_0(%arg0: i32, %arg1: i32) -> (i32, i32, i32) {
    %c0_i32 = arith.constant 0 : i32
    %c0_i32_0 = arith.constant 0 : i32
    return %arg0, %arg1, %c0_i32 : i32, i32, i32
  }
  func.func @transform_1(%arg0: i32, %arg1: i32) -> (i32, i32) {
    %c0_i32 = arith.constant 0 : i32
    %c0_i32_0 = arith.constant 0 : i32
    %c0_i32_1 = arith.constant 0 : i32
    return %c0_i32, %c0_i32_0 : i32, i32
  }
  func.func @transform_2(%arg0: i32, %arg1: i32) -> (i32, i32) {
    %c0_i32 = arith.constant 0 : i32
    %c0_i32_0 = arith.constant 0 : i32
    %c0_i32_1 = arith.constant 0 : i32
    return %c0_i32, %c0_i32_0 : i32, i32
  }
  func.func @transform_3(%arg0: i32, %arg1: i32) -> (i32, i32) {
    %c0_i32 = arith.constant 0 : i32
    %c0_i32_0 = arith.constant 0 : i32
    %c0_i32_1 = arith.constant 0 : i32
    return %c0_i32, %c0_i32_0 : i32, i32
  }
  func.func @transform_4(%arg0: i32, %arg1: i32) -> (i32, i32) {
    %c0_i32 = arith.constant 0 : i32
    %c0_i32_0 = arith.constant 0 : i32
    %c0_i32_1 = arith.constant 0 : i32
    return %c0_i32, %c0_i32_0 : i32, i32
  }
  func.func @transform_5(%arg0: i32, %arg1: i32) -> (i32, i32) {
    %c0_i32 = arith.constant 0 : i32
    %c0_i32_0 = arith.constant 0 : i32
    %c0_i32_1 = arith.constant 0 : i32
    return %c0_i32, %c0_i32_0 : i32, i32
  }
  func.func @transform_6(%arg0: i32, %arg1: i32) -> (i32, i32) {
    %c0_i32 = arith.constant 0 : i32
    %c0_i32_0 = arith.constant 0 : i32
    %c0_i32_1 = arith.constant 0 : i32
    return %c0_i32, %c0_i32_0 : i32, i32
  }
  func.func @transform_7(%arg0: i32, %arg1: i32) -> (i32, i32) {
    %c0_i32 = arith.constant 0 : i32
    %c0_i32_0 = arith.constant 0 : i32
    return %arg0, %c0_i32 : i32, i32
  }
}

</mosaic_0001>

<bundles_post_ra>
// kernel: tpu_custom_call.1
= control target key start
LH: loop header
LB: loop body
LE: loop exit
PB: predicated region body
PF: predicated region fallthrough
CT: control target
= control target key end

     0   :  { %12 = vsyncpa [#allocation5], 0  ;;  %s1212_s0 = inlined_call_operand.vmem [shape: f32[2,16,6], index: 0, kind: input, shape index: {}]   ;;  %s1213_s1 = inlined_call_operand.vmem [shape: f32[6,32], index: 1, kind: input, shape index: {}]   ;;  %s1214_s2 = inlined_call_operand.vmem [shape: f32[1,32], index: 2, kind: input, shape index: {}]   ;;  %s1215_s3 = inlined_call_operand.vmem [shape: f32[32,32], index: 3, kind: input, shape index: {}]   ;;  %s1216_s4 = inlined_call_operand.vmem [shape: f32[1,32], index: 4, kind: input, shape index: {}]   ;;  %s1217_s5 = inlined_call_operand.hbm [shape: f32[32,32], index: 5, kind: input, shape index: {}]   ;;  %s1218_s6 = inlined_call_operand.vmem [shape: f32[1,32], index: 6, kind: input, shape index: {}]   ;;  %s1219_s7 = inlined_call_operand.hbm [shape: f32[2,32], index: 7, kind: output, shape index: {}]  }
   0x1   :  { %13 = vsyncpa [#allocation6], 0  ;;  %s1043_s24 = smov 0   ;;  %s1045_s25 = smov 0  }
   0x2   :  { %s1047_s26 = smov 0   ;;  %s1049_s27 = smov 0  }
   0x3   :  { %s1051_s28 = smov 0  }
   0x4 LB: > { %s746_s29 = sadd.s32 4294967295, %s993_s28   ;;  %s28_s30 = sadd.s32 1, %s989_s27  ;;  %s993_s28 = sphi %s1051_s28, %s19_s28   ;;  %s989_s27 = sphi %s1049_s27, %s1234_s27   ;;  %s985_s26 = sphi %s1047_s26, %s1233_s26   ;;  %s981_s25 = sphi %s1045_s25, %s1232_s25   ;;  %s977_s24 = sphi %s1043_s24, %s1231_s24  }
   0x5   : > { %p29_p0 = scmp.ge.s32.totalorder %s28_s30, 2  ;;  %s40_s8 = sadd.s32 1, %s981_s25 }
   0x6   : > { %p47_p1 = scmp.ne.s32.totalorder %s981_s25, %s977_s24  ;;  %p48_p2 = scmp.eq.s32.totalorder %s993_s28, 0 }
   0x7   : > { %s1236_s30 = smov (%p29_p0, %s28_s30), 0  ;;  %p747_p4 = scmp.ge.s32.totalorder %s993_s28, 1 }
   0x8   : > { %p1076_p3 = por %p48_p2, %p47_p1  ;;  %s36_s10 = ssub.s32 %s989_s27, %s1236_s30 }
   0x9   : > { %p216_p5 = scmp.lt.s32.totalorder %s993_s28, 3  ;;  %p38_p6 = scmp.eq.s32.totalorder %s36_s10, 0 }
   0xa   : > { %s1223_s9 = scalar_select %p1076_p3, 1, 0 }
   0xb   : > { %p1084_p7 = pnand %p747_p4, %p216_p5  ;;  %p1090_p8 = scmp.eq.s32.totalorder %s746_s29, 0 }
   0xc   : > { %s1095_s13 = scalar_select %p38_p6, %s981_s25, %s40_s8  }
   0xd   : > { %s1224_s11 = scalar_select %p1084_p7, 1, 0 }
   0xe   : > { %s1225_s12 = scalar_select %p1090_p8, 1, 0 }
   0xf   : > { %p833_p9 = pneg %p1084_p7  ;;  %s995_s14 = smov [#allocation4]  }
  0x10   : > { %s240_s15 = sshll.u32 %s995_s14, 4  ;;  %s893_s19 = scalar_lea.hbm %s1217_s5, 512  ;;  %s241_s15 = int_to_ptr.vmem [resolvable:$true] %s240_s15 }
  0x11   : > { %p1101_p10 = pnand %p1090_p8, %p833_p9  ;;  %p894_p11 = scmp.ne.s32.totalorder %s1217_s5, %s893_s19 }
  0x12   : > { %p900_p1 = scmp.lt.u32.totalorder %s893_s19, %s1217_s5 }
  0x13   : > { %p895_p12 = pneg %p1101_p10 }
  0x15   : > { %p896_p13 = pnand %p895_p12, %p894_p11 }
  0x17   : > { %p897_p0 = pneg %p896_p13 }
  0x19   : > { %p902_p2 = pnand %p900_p1, %p897_p0 }
  0x1b   : > { %905 = shalt.err (!%p902_p2)
}
  0x1c   : > { %s906_s8 = scalar_lea.vmem %s241_s15, 512  ;;  %p914_p9 = scmp.lt.s32.totalorder %s241_s15, %s241_s15 }
  0x1d   : > { %p907_p4 = scmp.ne.s32.totalorder %s241_s15, %s906_s8  ;;  %p915_p8 = scmp.lt.s32.totalorder %s906_s8, %s906_s8 }
  0x1f   : > { %p909_p5 = pnand %p907_p4, %p895_p12  ;;  %p916_p7 = por %p915_p8, %p914_p9 }
  0x21   : > { %p910_p6 = pneg %p909_p5 }
  0x23   : > { %p917_p3 = pnand %p916_p7, %p910_p6 }
  0x25   : > { %920 = shalt.err (!%p917_p3)
}
  0x26   : > { %s996_s10 = smov 128   ;;  %s997_s14 = smov 8  }
  0x27   : > { %836 = dma.hbm_to_vmem [thread:$0]  (!%p1101_p10), %s1217_s5, 512, %s241_s15, [#allocation5], %s996_s10, %s996_s10, %s997_s14  }
  0x28   : > { %p749_p11 = scmp.ge.s32.totalorder %s993_s28, 2 }
  0x29   : > { %p1227_p13 = scmp.ne.s32.totalorder (!%p749_p11), %s1223_s9, 0 }
  0x2a   : > { %253 = sbr.rel (%p749_p11) target bundleno = 56 (0x38), region = 40 }
  0x31   : > { %256 = sbr.rel (!%p1227_p13) target bundleno = 56 (0x38), region = 44  ;;  %s258_s19 = sand.u32 (%p1227_p13), 1, %s981_s25  }
  0x32   : > { %s751_s20 = sshll.u32 (%p1227_p13), %s989_s27, 3  ;;  %s750_s21 = sshll.u32 (%p1227_p13), %s258_s19, 4 }
  0x33   : > { %s265_s8 = scalar_lea.vmem (%p1227_p13), %s1212_s0, %s751_s20  ;;  %s260_s16 = scalar_lea.vmem (%p1227_p13), [#allocation3], %s750_s21 }
  0x34   : > { %v295_v0 = vld [vmem:[%s265_s8] sm:$0xff] (%p1227_p13)  ;;  %v297_v1 = vld [vmem:[%s265_s8 + $0x10] sm:$0xff] (%p1227_p13) }
  0x35   : > { %296 = vst [vmem:[%s260_s16] sm:$0xff] (%p1227_p13), %v295_v0  ;;  %298 = vst [vmem:[%s260_s16 + $0x8] sm:$0xff] (%p1227_p13), %v297_v1 }
  0x38 PF: > { %p1228_p3 = scmp.ne.s32.totalorder %s1224_s11, 0 }
  0x39   : > { %s310_s9 = sand.u32 (!%p1228_p3), 1, %s977_s24   ;;  %p1229_p7 = scmp.ne.s32.totalorder (!%p1228_p3), %s1225_s12, 0 }
  0x3a   : > { %307 = sbr.rel (%p1228_p3) target bundleno = 800 (0x320), region = 82  ;;  %s753_s15 = sshll.u32 (!%p1228_p3), %s310_s9, 4 }
  0x3b   : > { %s312_s10 = scalar_lea.vmem (!%p1228_p3), [#allocation3], %s753_s15 }
  0x41   : > { %968 = dma.done.wait (%p1229_p7), [#allocation5], 512  }
  0x42   : > { %970 = vsyncadd (%p1229_p7), [#allocation5], 4294966784  ;;  %p755_p8 = scmp.ne.s32.totalorder %s985_s26, 0 }
  0x43   : > { %vm345_vm0 = vcmask (!%p755_p8), 254976   ;;  %v998_v2 = vmov (!%p755_p8), -inf  }
  0x44   : > { %344 = sbr.rel (%p755_p8) target bundleno = 75 (0x4b), region = 94  ;;  %346 = vst.msk [vmem:[#allocation2] sm:$0x3] (!%p755_p8), %vm345_vm0, %v998_v2 }
  0x4b PF: > { %v349_v3 = vld [vmem:[%s1213_s1] sm:$0x3f]  ;;  %vm364_vm1 = vcmask 1045504   ;;  %vm357_vm2 = vcmask 48128   ;;  %v462_v7 = vld [vmem:[%s1215_s3 + $0x8] sm:$0xff]  ;;  %v463_v8 = vld [vmem:[%s1215_s3 + $0x10] sm:$0xff] }
  0x4c   : > { %v347_v4 = vld [vmem:[%s312_s10] sm:$0xff]  ;;  %v348_v5 = vld [vmem:[%s312_s10 + $0x8] sm:$0xff]  ;;  %784 = vmatprep.subr.msk.mxu0 %vm364_vm1, %v349_v3  ;;  %vm472_vm3 = vcmask 261120   ;;  %vm571_vm4 = vcmask 1041409   ;;  %vm575_vm5 = vcmask 254976   ;;  %p763_p10 = scmp.ne.s32.totalorder %s985_s26, 1 }
  0x4d   : > { %786 = vmatprep.mubr.msk.f32.mxu0 %vm357_vm2, %v347_v4  ;;  %785 = vmatpush3.msk.msra.mxu0 %vm364_vm1, %v349_v3  ;;  %v461_v6 = vld [vmem:[%s1215_s3] sm:$0xff]  ;;  %v464_v10 = vld [vmem:[%s1215_s3 + $0x18] sm:$0xff]  ;;  %v583_v58 = vld [vmem:[#allocation4 + $0x8] sm:$0xff] (!%p763_p10)  ;;  %v999_v60 = vmov (!%p763_p10), 0.0|0.0   ;;  %vm1000_vm6 = vmmov (!%p763_p10), 0   ;;  %v1001_v63 = vmov (!%p763_p10), 0.0  }
  0x4e   : > { %787 = vmatmul.mubr.msk.f32.vlgmr.msra.gmra.mrb[0].mxu0 %vm357_vm2, %v348_v5  ;;  %v811_v9 = vpack.c.bf16 %v462_v7, %v461_v6  ;;  %v815_v11 = vpack.c.bf16 %v464_v10, %v463_v8  ;;  %v756_v12 = vld [vmem:[%s1214_s2] ss:$0 sm:$0xff]  ;;  %v582_v57 = vld [vmem:[#allocation4] sm:$0xff] (!%p763_p10)  ;;  %v584_v59 = vld [vmem:[#allocation4 + $0x10] sm:$0xff] (!%p763_p10)  ;;  %819 = vmatprep.subr.bf16.mxu0 (!%p763_p10), %v999_v60 }
  0x4f   : > { %v760_v35 = vld [vmem:[%s1216_s4] ss:$0 sm:$0xff]  ;;  %v820_v61 = vpack.c.bf16 (!%p763_p10), %v583_v58, %v582_v57  ;;  %808 = vmatprep.mubr.msk.f32.mxu0 (!%p763_p10), %vm1000_vm6, %v1001_v63 }
  0x50   : > { %812 = vmatprep.subr.bf16.mxu1 %v811_v9  ;;  %v568_v54 = vld [vmem:[#allocation2] sm:$0x3] }
  0x51   : > { %814 = vmatpush3.bf16.msra.mxu1 %v811_v9  ;;  %v585_v62 = vld [vmem:[#allocation4 + $0x18] sm:$0xff] (!%p763_p10)  ;;  %821 = vmatpush3.bf16.msra.mxu0 (!%p763_p10), %v820_v61 }
  0x52   : > { %816 = vmatprep.subr.bf16.mxu1 %v815_v11  ;;  %v823_v0 = vpack.c.bf16 (!%p763_p10), %v585_v62, %v584_v59  ;;  %822 = vmatprep.subr.bf16.mxu0 (!%p763_p10), %v999_v60  ;;  %v764_v2 = vld [vmem:[%s1218_s6] ss:$0 sm:$0xff] (!%p763_p10) }
  0x55   : > { %818 = vmatpush3.bf16.msra.mxu1 %v815_v11  ;;  %824 = vmatpush3.bf16.msra.mxu0 (!%p763_p10), %v823_v0 }
 0x121   : > { %v788_v13 = vpop.f32.mrb[0].mxu0 }
 0x122   : > { %v440_v14 = vadd.f32 %v788_v13, %v756_v12  ;;  %v434_v15 = vpop.f32.mrb[1].mxu0 }
 0x123   : > { %v435_v16 = vadd.f32 %v756_v12, %v434_v15 }
 0x124   : > { %v444_v17 = vmul.f32 %v440_v14, %v440_v14 }
 0x125   : > { %v443_v18 = vmul.f32 %v435_v16, %v435_v16 }
 0x126   : > { %v446_v19 = vmul.f32 %v444_v17, %v440_v14 }
 0x127   : > { %v445_v20 = vmul.f32 %v443_v18, %v435_v16 }
 0x128   : > { %v448_v21 = vmul.f32 0.044715, %v446_v19 }
 0x129   : > { %v447_v22 = vmul.f32 0.044715, %v445_v20 }
 0x12a   : > { %v450_v23 = vadd.f32 %v448_v21, %v440_v14 }
 0x12b   : > { %v449_v24 = vadd.f32 %v447_v22, %v435_v16 }
 0x12c   : > { %v452_v25 = vmul.f32 0.7978846, %v450_v23 }
 0x12d   : > { %v451_v26 = vmul.f32 0.7978846, %v449_v24 }
 0x12e   : > { %889 = vtanh.f32 %v452_v25 }
 0x12f   : > { %891 = vtanh.f32 %v451_v26 }
 0x138   : > { %v890_v27 = vpop.eup %889 }
 0x139   : > { %v892_v28 = vpop.eup %891  ;;  %v456_v29 = vadd.f32 1.0, %v890_v27 }
 0x13a   : > { %v455_v30 = vadd.f32 1.0, %v892_v28 }
 0x13b   : > { %v458_v31 = vmul.f32 0.5, %v456_v29 }
 0x13c   : > { %v457_v32 = vmul.f32 0.5, %v455_v30 }
 0x13d   : > { %v460_v34 = vmul.f32 %v458_v31, %v440_v14 }
 0x13e   : > { %v459_v33 = vmul.f32 %v457_v32, %v435_v16 }
 0x140   : > { %797 = vmatprep.mubr.msk.f32.mxu1 %vm472_vm3, %v459_v33 }
 0x141   : > { %798 = vmatmul.mubr.msk.f32.vlgmr.msra.gmra.mrb[0].mxu1 %vm472_vm3, %v460_v34 }
 0x214   : > { %v799_v36 = vpop.f32.mrb[0].mxu1 }
 0x215   : > { %v551_v37 = vadd.f32 %v799_v36, %v760_v35  ;;  %v545_v38 = vpop.f32.mrb[1].mxu1 }
 0x216   : > { %v546_v39 = vadd.f32 %v760_v35, %v545_v38 }
 0x217   : > { %v561_v40 = vsel %vm472_vm3, %v551_v37, -inf }
 0x218   : > { %v562_v41 = vrot.slane %v561_v40, 4  ;;  %v554_v42 = vsel %vm472_vm3, %v546_v39, -inf }
 0x219   : > { %v555_v43 = vrot.slane %v554_v42, 4 }
 0x21a   : > { %v563_v44 = vmax.f32 %v561_v40, %v562_v41 }
 0x21b   : > { %v556_v45 = vmax.f32 %v554_v42, %v555_v43 }
 0x21c   : > { %v564_v46 = vrot.slane %v563_v44, 2 }
 0x21d   : > { %v557_v47 = vrot.slane %v556_v45, 2 }
 0x21e   : > { %v565_v48 = vmax.f32 %v563_v44, %v564_v46 }
 0x21f   : > { %v558_v49 = vmax.f32 %v556_v45, %v557_v47 }
 0x220   : > { %v566_v50 = vrot.slane %v565_v48, 1 }
 0x221   : > { %v559_v51 = vrot.slane %v558_v49, 1 }
 0x222   : > { %v567_v52 = vmax.f32 %v565_v48, %v566_v50  ;;  %580 = sbr.rel (%p763_p10) target bundleno = 775 (0x307), region = 98 }
 0x223   : > { %v560_v53 = vmax.f32 %v558_v49, %v559_v51 }
 0x225   : > { %v572_v55 = vsel %vm571_vm4, %v567_v52, %v560_v53 }
 0x226   : > { %v574_v56 = vmax.f32 %v568_v54, %v572_v55 }
 0x228   : > { %576 = vst.msk [vmem:[#allocation2] sm:$0x3] %vm575_vm5, %v574_v56 }
 0x22f   : > { %v581_v1 = vld [vmem:[#allocation2] sm:$0x3] }
 0x230   : > { %809 = vmatmul.mubr.msk.f32.vlgmr.msra.gmra.mrb[0].mxu0 %vm472_vm3, %v581_v1 }
 0x303   : > { %v662_v3 = vpop.f32.mrb[0].mxu0 }
 0x304   : > { %v663_v4 = vadd.f32 %v764_v2, %v662_v3  ;;  %v810_v5 = vpop.f32.mrb[1].mxu0 }
 0x306   : > { %666 = vst.msk [vmem:[#allocation7] sm:$0x3] %vm575_vm5, %v663_v4 }
 0x307 PF: > { %p1171_p12 = scmp.eq.s32.totalorder %s746_s29, 1  ;;  %s1002_s14 = smov [#allocation7]  }
 0x308   : > { %s676_s11 = sshll.u32 %s1002_s14, 4  ;;  %s677_s11 = int_to_ptr.vmem [resolvable:$true] %s676_s11 }
 0x309   : > { %s921_s24 = scalar_lea.vmem %s677_s11, 32  ;;  %p928_p4 = scmp.lt.s32.totalorder %s677_s11, %s677_s11 }
 0x30a   : > { %p922_p0 = scmp.ne.s32.totalorder %s677_s11, %s921_s24  ;;  %p929_p5 = scmp.lt.s32.totalorder %s921_s24, %s921_s24 }
 0x30c   : > { %p923_p1 = pnand %p922_p0, %p1171_p12  ;;  %p930_p6 = por %p929_p5, %p928_p4 }
 0x30e   : > { %p924_p2 = pneg %p923_p1 }
 0x310   : > { %p931_p9 = pnand %p930_p6, %p924_p2 }
 0x312   : > { %934 = shalt.err (!%p931_p9)
}
 0x313   : > { %s935_s29 = scalar_lea.hbm %s1219_s7, 32 }
 0x314   : > { %p936_p11 = scmp.ne.s32.totalorder %s1219_s7, %s935_s29  ;;  %p941_p7 = scmp.lt.u32.totalorder %s935_s29, %s1219_s7 }
 0x316   : > { %p937_p13 = pnand %p936_p11, %p1171_p12 }
 0x318   : > { %p938_p3 = pneg %p937_p13 }
 0x31a   : > { %p943_p8 = pnand %p941_p7, %p938_p3 }
 0x31c   : > { %946 = shalt.err (!%p943_p8)
}
 0x31d   : > { %830 = dma.vmem_to_hbm [thread:$0]  (%p1171_p12), %s677_s11, 32, %s1219_s7, [#allocation6]  }
 0x31e   : > { %972 = dma.done.wait (%p1171_p12), [#allocation6], 32  }
 0x31f   : > { %974 = vsyncadd (%p1171_p12), [#allocation6], 4294967264 }
 0x320 PF: > { %s19_s28 = sadd.s32 1, %s993_s28   ;;  %s1231_s24 = smov %s981_s25 }
 0x321   : > { %p16_p10 = scmp.ge.s32.totalorder %s19_s28, 4   ;;  %s1232_s25 = smov %s1095_s13 }
 0x322   : > { %s1233_s26 = smov %s989_s27  ;;  %s1234_s27 = smov %s1236_s30 }
 0x323   :  { %18 = sbr.rel (!%p16_p10) target bundleno = 4 (0x4), region = 132 }
 0x32a   :  { %689 = vsyncpa [#allocation5], 1 }
 0x32b   :  { %691 = vsyncpa [#allocation5 + $0x1], 1 }
 0x32c   :  { %692 = vsyncpa [#allocation6], 1 }
 0x32d   :  { %694 = vsyncpa [#allocation6 + $0x1], 1 }

</bundles_post_ra>
